<compile_context>
chip_gen: v6e
topology: v6e:2x2x1
jax: 0.10.0
libtpu: 0.0.40
codegen_flags: <defaults>
</compile_context>

<pallas_src>
import functools

import jax
import jax.numpy as jnp
from jax.experimental import pallas as pl
from jax.experimental.pallas import tpu as pltpu

IN_FEATURES = 32
OUT_FEATURES = 2
PACK = 128 // IN_FEATURES          # 4 batch rows per 128-lane packed row
PACKED_W = PACK * IN_FEATURES      # 128
PACKED_O = PACK * OUT_FEATURES     # 8


def _cdiv(a, b):
    return -(-a // b)


def _round_up(a, b):
    return _cdiv(a, b) * b


@functools.lru_cache(maxsize=1)
def _device_tuning():
    """Returns (default_tile_rows, vmem_limit_bytes or None) per generation."""
    kind = ""
    try:
        kind = jax.devices()[0].device_kind.lower()
    except Exception:
        pass
    if "v7" in kind or "tpu7" in kind:
        # v7x: 64 MiB VMEM/TC -> 4 MiB x tiles (8 MiB double-buffered).
        return 8192, 48 * 1024 * 1024
    if "v5" in kind or "v6" in kind:
        # v5e/v5p/v6e: 128 MiB VMEM -> 8 MiB x tiles (16 MiB double-buffered).
        return 16384, 64 * 1024 * 1024
    # Unknown / older generation: stay conservative, keep compiler defaults.
    return 4096, None


def pack_weight(weight):
    """(2, 32) PyTorch-layout weight -> (128, 8) block-diagonal kron(I4, W^T).

    Hoisted out of the per-call forward path: pack once, reuse every call.
    """
    weight = jnp.asarray(weight, jnp.float32)
    assert weight.shape == (OUT_FEATURES, IN_FEATURES)
    return jnp.kron(jnp.eye(PACK, dtype=jnp.float32), weight.T)


def _make_kernel(valid_rows_last, has_overhang):
    def kernel(x_ref, w_ref, out_ref):
        t = pl.program_id(0)

        # Zero the resident accumulator block on the first grid step.
        @pl.when(t == 0)
        def _():
            out_ref[...] = jnp.zeros_like(out_ref)

        # (tile_r, 128) @ (128, 8) on the MXU; K=128 lane-dense contraction.
        y = jnp.dot(x_ref[...], w_ref[...], preferred_element_type=jnp.float32)
        d = y - 1.0

        if not has_overhang:
            # Steady-state path: no masking work at all.
            out_ref[...] += jnp.sum(d * d)
        else:
            last = pl.num_programs(0) - 1

            @pl.when(t != last)
            def _():
                out_ref[...] += jnp.sum(d * d)

            @pl.when(t == last)
            def _():
                # The final tile overhangs the packed array; rows past the end
                # hold unspecified data, so zero them *before* squaring.  Only
                # this single grid step pays for the mask.
                row = jax.lax.broadcasted_iota(jnp.int32, d.shape, 0)
                dm = jnp.where(row < valid_rows_last, d, 0.0)
                out_ref[...] += jnp.sum(dm * dm)

    return kernel


def _forward_impl(x, w_block, max_tile_rows=None):
    """x: (B, 32) float32; w_block: (128, 8) packed weight (see pack_weight)."""
    x = jnp.asarray(x, jnp.float32)
    batch = x.shape[0]
    assert x.shape[1] == IN_FEATURES
    assert w_block.shape == (PACKED_W, PACKED_O)

    default_tile, vmem_limit = _device_tuning()
    if max_tile_rows is None:
        max_tile_rows = default_tile
    max_tile_rows = max(8, _round_up(int(max_tile_rows), 8))

    # ---- pack x to a lane-dense (rows, 128) view ---------------------------
    batch4 = _round_up(batch, PACK)
    pad_rows = batch4 - batch                      # 0..3 zero rows
    if pad_rows:
        # TODO(synk): for huge unaligned batches, handle the <=3 tail rows
        # separately instead of this whole-array pad copy.
        x = jnp.pad(x, ((0, pad_rows), (0, 0)))
    rows = batch4 // PACK
    x_packed = x.reshape(rows, PACKED_W)           # row-major: free when no pad

    # ---- batch tiling (single grid step for small batches) -----------------
    tile_r = min(max_tile_rows, _round_up(rows, 8))
    ntiles = _cdiv(rows, tile_r)
    valid_rows_last = rows - (ntiles - 1) * tile_r
    has_overhang = valid_rows_last != tile_r

    if rows < tile_r:
        # Tiny-batch guard so the array is at least one block tall; the padded
        # zero rows are excluded by the last-tile mask (tiny, <= 7 rows).
        x_packed = jnp.pad(x_packed, ((0, tile_r - rows), (0, 0)))

    flops = 2 * rows * PACKED_W * PACKED_O + 3 * rows * PACKED_O
    bytes_accessed = (rows * PACKED_W + PACKED_W * PACKED_O + 8 * 128) * 4

    compiler_kwargs = {} if vmem_limit is None else {"vmem_limit_bytes": vmem_limit}

    acc = pl.pallas_call(
        _make_kernel(valid_rows_last, has_overhang),
        out_shape=jax.ShapeDtypeStruct((8, 128), jnp.float32),
        grid=(ntiles,),
        in_specs=[
            pl.BlockSpec((tile_r, PACKED_W), lambda t: (t, 0)),
            pl.BlockSpec((PACKED_W, PACKED_O), lambda t: (0, 0)),
        ],
        out_specs=pl.BlockSpec((8, 128), lambda t: (0, 0)),
        compiler_params=pltpu.CompilerParams(
            dimension_semantics=("arbitrary",), **compiler_kwargs),
        cost_estimate=pl.CostEstimate(
            flops=int(flops), transcendentals=0,
            bytes_accessed=int(bytes_accessed)),
    )(x_packed, w_block)

    # Every element of the accumulator block holds the same running sum.
    # Each padded zero batch row contributed exactly (0-1)^2 per output column.
    sse = acc[0, 0] - jnp.float32(pad_rows * OUT_FEATURES)
    return sse / jnp.float32(batch * OUT_FEATURES)


boring_model_loss = jax.jit(_forward_impl, static_argnames=("max_tile_rows",))


def boring_model_forward(x, weight, max_tile_rows=None):
    """Convenience wrapper taking the raw (2, 32) PyTorch-layout weight."""
    return boring_model_loss(x, pack_weight(weight), max_tile_rows=max_tile_rows)


def _reference(x, weight):
    y = x.astype(jnp.float32) @ weight.T.astype(jnp.float32)
    return jnp.mean((y - 1.0) ** 2)


if __name__ == "__main__":
    key = jax.random.PRNGKey(0)
    k_w, k_x1, k_x2, k_x3 = jax.random.split(key, 4)

    # Deterministic init mimicking Linear's uniform(-1/sqrt(32), 1/sqrt(32)).
    bound = 1.0 / (IN_FEATURES ** 0.5)
    weight = jax.random.uniform(k_w, (OUT_FEATURES, IN_FEATURES),
                                dtype=jnp.float32, minval=-bound, maxval=bound)
    w_block = pack_weight(weight)   # packed once, reused every call

    # Case 1: BoringModel-scale batch -> single grid step fast path.
    x1 = jax.random.normal(k_x1, (8, IN_FEATURES), dtype=jnp.float32)
    loss1 = boring_model_loss(x1, w_block, max_tile_rows=None)
    jax.block_until_ready(loss1)
    ref1 = _reference(x1, weight)
    assert jnp.allclose(loss1, ref1, rtol=1e-4, atol=1e-5), (loss1, ref1)

    # Case 2: non-multiple-of-4 batch + tiny tiles -> multi-step accumulation,
    # masked partial last tile, and the <=3-row pad correction.
    x2 = jax.random.normal(k_x2, (203, IN_FEATURES), dtype=jnp.float32)
    loss2 = boring_model_loss(x2, w_block, max_tile_rows=8)
    jax.block_until_ready(loss2)
    ref2 = _reference(x2, weight)
    assert jnp.allclose(loss2, ref2, rtol=1e-4, atol=1e-5), (loss2, ref2)

    # Case 3: multiple-of-4 batch that is not tile-aligned -> zero-copy packing
    # (no jnp.pad of x) with the masked last tile only.
    x3 = jax.random.normal(k_x3, (96, IN_FEATURES), dtype=jnp.float32)
    loss3 = boring_model_loss(x3, w_block, max_tile_rows=16)
    jax.block_until_ready(loss3)
    ref3 = _reference(x3, weight)
    assert jnp.allclose(loss3, ref3, rtol=1e-4, atol=1e-5), (loss3, ref3)

    print("KERNEL_OK")
</pallas_src>

<mosaic_0001>
module attributes {stable_mosaic.version = 11 : i64} {
  func.func @kernel(%arg0: i32, %arg1: memref<8x128xf32, #tpu.memory_space<vmem>>, %arg2: memref<128x8xf32, #tpu.memory_space<vmem>>, %arg3: memref<8x128xf32, #tpu.memory_space<vmem>>) attributes {dimension_semantics = [#tpu.dimension_semantics<arbitrary>], iteration_bounds = array<i64: 1>, scalar_prefetch = 0 : i64, scratch_operands = 0 : i64, tpu.core_type = #tpu.core_type<tc>, window_params = [{transform_indices = @transform_0, window_bounds = array<i64: 8, 128>}, {pipeline_mode = #tpu.pipeline_mode<synchronous>, transform_indices = @transform_1, window_bounds = array<i64: 128, 8>}, {pipeline_mode = #tpu.pipeline_mode<synchronous>, transform_indices = @transform_2, window_bounds = array<i64: 8, 128>}]} {
    %c0_i32 = arith.constant 0 : i32
    %0 = arith.cmpi eq, %arg0, %c0_i32 : i32
    %1 = arith.extui %0 : i1 to i32
    %c0_i32_0 = arith.constant 0 : i32
    %2 = arith.cmpi ne, %1, %c0_i32_0 : i32
    scf.if %2 {
      %cst_9 = arith.constant 0.000000e+00 : f32
      %14 = vector.broadcast %cst_9 : f32 to vector<8x128xf32>
      %c0_10 = arith.constant 0 : index
      %c0_11 = arith.constant 0 : index
      %15 = vector.load %arg3[%c0_10, %c0_11] : memref<8x128xf32, #tpu.memory_space<vmem>>, vector<8x128xf32>
      tpu.vector_store %arg3[%c0_10, %c0_11], %14 {strides = array<i32>} : memref<8x128xf32, #tpu.memory_space<vmem>>, vector<8x128xf32>,
    } else {
    }
    %c0 = arith.constant 0 : index
    %c0_1 = arith.constant 0 : index
    %3 = vector.load %arg1[%c0, %c0_1] : memref<8x128xf32, #tpu.memory_space<vmem>>, vector<8x128xf32>
    %c0_2 = arith.constant 0 : index
    %c0_3 = arith.constant 0 : index
    %4 = vector.load %arg2[%c0_2, %c0_3] : memref<128x8xf32, #tpu.memory_space<vmem>>, vector<128x8xf32>
    %cst = arith.constant dense<0.000000e+00> : vector<8x8xf32>
    %5 = tpu.matmul %3, %4, %cst {dimension_numbers = #tpu.dot_dimension_numbers<[1], [0], [0], [1], [0, 0, 1, 1], [], []>} : vector<8x128xf32>, vector<128x8xf32>, vector<8x8xf32> -> vector<8x8xf32>
    %cst_4 = arith.constant 1.000000e+00 : f32
    %6 = vector.broadcast %cst_4 : f32 to vector<8x8xf32>
    %7 = arith.subf %5, %6 : vector<8x8xf32>
    %c0_i32_5 = arith.constant 0 : i32
    %8 = arith.cmpi ne, %arg0, %c0_i32_5 : i32
    %9 = arith.extui %8 : i1 to i32
    %c0_i32_6 = arith.constant 0 : i32
    %10 = arith.cmpi ne, %9, %c0_i32_6 : i32
    scf.if %10 {
      %c0_9 = arith.constant 0 : index
      %c0_10 = arith.constant 0 : index
      %14 = vector.load %arg3[%c0_9, %c0_10] : memref<8x128xf32, #tpu.memory_space<vmem>>, vector<8x128xf32>
      %15 = arith.mulf %7, %7 : vector<8x8xf32>
      %16 = vector.shape_cast %15 : vector<8x8xf32> to vector<1x8x8xf32>
      %cst_11 = arith.constant dense<0.000000e+00> : vector<1xf32>
      %17 = vector.multi_reduction <add>, %16, %cst_11 [1, 2] : vector<1x8x8xf32> to vector<1xf32>
      %18 = vector.shape_cast %17 : vector<1xf32> to vector<1x1x1xf32>
      %19 = vector.extract %18[0, 0, 0] : f32 from vector<1x1x1xf32>
      %20 = vector.broadcast %19 : f32 to vector<8x128xf32>
      %21 = arith.addf %14, %20 : vector<8x128xf32>
      %c0_12 = arith.constant 0 : index
      %c0_13 = arith.constant 0 : index
      %22 = vector.load %arg3[%c0_12, %c0_13] : memref<8x128xf32, #tpu.memory_space<vmem>>, vector<8x128xf32>
      tpu.vector_store %arg3[%c0_12, %c0_13], %21 {strides = array<i32>} : memref<8x128xf32, #tpu.memory_space<vmem>>, vector<8x128xf32>,
    } else {
    }
    %c0_i32_7 = arith.constant 0 : i32
    %11 = arith.cmpi eq, %arg0, %c0_i32_7 : i32
    %12 = arith.extui %11 : i1 to i32
    %c0_i32_8 = arith.constant 0 : i32
    %13 = arith.cmpi ne, %12, %c0_i32_8 : i32
    scf.if %13 {
      %14 = tpu.iota {dimensions = array<i32: 0>} : vector<8x8xi32>
      %c2_i32 = arith.constant 2 : i32
      %15 = vector.broadcast %c2_i32 : i32 to vector<8x8xi32>
      %16 = arith.cmpi slt, %14, %15 : vector<8x8xi32>
      %cst_9 = arith.constant 0.000000e+00 : f32
      %17 = vector.broadcast %cst_9 : f32 to vector<8x8xf32>
      %18 = arith.select %16, %7, %17 : vector<8x8xi1>, vector<8x8xf32>
      %c0_10 = arith.constant 0 : index
      %c0_11 = arith.constant 0 : index
      %19 = vector.load %arg3[%c0_10, %c0_11] : memref<8x128xf32, #tpu.memory_space<vmem>>, vector<8x128xf32>
      %20 = arith.mulf %18, %18 : vector<8x8xf32>
      %21 = vector.shape_cast %20 : vector<8x8xf32> to vector<1x8x8xf32>
      %cst_12 = arith.constant dense<0.000000e+00> : vector<1xf32>
      %22 = vector.multi_reduction <add>, %21, %cst_12 [1, 2] : vector<1x8x8xf32> to vector<1xf32>
      %23 = vector.shape_cast %22 : vector<1xf32> to vector<1x1x1xf32>
      %24 = vector.extract %23[0, 0, 0] : f32 from vector<1x1x1xf32>
      %25 = vector.broadcast %24 : f32 to vector<8x128xf32>
      %26 = arith.addf %19, %25 : vector<8x128xf32>
      %c0_13 = arith.constant 0 : index
      %c0_14 = arith.constant 0 : index
      %27 = vector.load %arg3[%c0_13, %c0_14] : memref<8x128xf32, #tpu.memory_space<vmem>>, vector<8x128xf32>
      tpu.vector_store %arg3[%c0_13, %c0_14], %26 {strides = array<i32>} : memref<8x128xf32, #tpu.memory_space<vmem>>, vector<8x128xf32>,
    } else {
    }
    return
  }
  func.func @transform_0(%arg0: i32) -> (i32, i32) {
    %c0_i32 = arith.constant 0 : i32
    %c0_i32_0 = arith.constant 0 : i32
    return %arg0, %c0_i32 : i32, i32
  }
  func.func @transform_1(%arg0: i32) -> (i32, i32) {
    %c0_i32 = arith.constant 0 : i32
    %c0_i32_0 = arith.constant 0 : i32
    %c0_i32_1 = arith.constant 0 : i32
    return %c0_i32, %c0_i32_0 : i32, i32
  }
  func.func @transform_2(%arg0: i32) -> (i32, i32) {
    %c0_i32 = arith.constant 0 : i32
    %c0_i32_0 = arith.constant 0 : i32
    %c0_i32_1 = arith.constant 0 : i32
    return %c0_i32, %c0_i32_0 : i32, i32
  }
}

</mosaic_0001>

<bundles_post_ra>
// kernel: _forward_impl.1
= control target key start
LH: loop header
LB: loop body
LE: loop exit
PB: predicated region body
PF: predicated region fallthrough
CT: control target
= control target key end

     0   :  { %v208_v0 = vmov 0.0   ;;  %vm209_vm0 = vmmov 0   ;;  %v127_v18 = vlaneseq  ;;  %vm133_vm2 = vcmask 64512   ;;  %s279_s1 = inlined_call_operand.vmem [shape: f32[128,8], index: 1, kind: input, shape index: {}]   ;;  %s280_s0 = inlined_call_operand.vmem [shape: f32[8,128], index: 0, kind: input, shape index: {}]   ;;  %s281_s2 = inlined_call_operand.vmem [shape: f32[8,128], index: 2, kind: output, shape index: {}]  }
   0x1   :  { %169 = vmatprep.subr.mxu0 %v208_v0  ;;  %v32_v1 = vld [vmem:[%s279_s1 + $0x78] sm:$0xff]  ;;  %v31_v2 = vld [vmem:[%s279_s1 + $0x70] sm:$0xff]  ;;  %201 = vmatprep.mubr.msk.f32.mxu0 %vm209_vm0, %v208_v0  ;;  %v30_v3 = vld [vmem:[%s279_s1 + $0x68] sm:$0xff] }
   0x2   :  { %170 = vmatpush3.msra.mxu0 %v32_v1  ;;  %v29_v4 = vld [vmem:[%s279_s1 + $0x60] sm:$0xff]  ;;  %v28_v5 = vld [vmem:[%s279_s1 + $0x58] sm:$0xff]  ;;  %v27_v6 = vld [vmem:[%s279_s1 + $0x50] sm:$0xff]  ;;  %v128_v19 = vshrl.u32 %v127_v18, 7 }
   0x3   :  { %171 = vmatprep.subr.mxu0 %v208_v0  ;;  %v26_v7 = vld [vmem:[%s279_s1 + $0x48] sm:$0xff]  ;;  %v25_v8 = vld [vmem:[%s279_s1 + $0x40] sm:$0xff]  ;;  %v24_v9 = vld [vmem:[%s279_s1 + $0x38] sm:$0xff] }
   0x4   :  { %172 = vmatpush3.msra.mxu0 %v31_v2  ;;  %v23_v10 = vld [vmem:[%s279_s1 + $0x30] sm:$0xff]  ;;  %v22_v11 = vld [vmem:[%s279_s1 + $0x28] sm:$0xff]  ;;  %v21_v12 = vld [vmem:[%s279_s1 + $0x20] sm:$0xff]  ;;  %vm129_vm1 = vcmp.lt.s32.totalorder %v128_v19, 2 }
   0x5   :  { %173 = vmatprep.subr.mxu0 %v208_v0  ;;  %v20_v13 = vld [vmem:[%s279_s1 + $0x18] sm:$0xff]  ;;  %v19_v14 = vld [vmem:[%s279_s1 + $0x10] sm:$0xff]  ;;  %v18_v15 = vld [vmem:[%s279_s1 + $0x8] sm:$0xff] }
   0x6   :  { %174 = vmatpush3.msra.mxu0 %v30_v3  ;;  %v17_v16 = vld [vmem:[%s279_s1] sm:$0xff] }
   0x7   :  { %175 = vmatprep.subr.mxu0 %v208_v0  ;;  %v16_v17 = vld [vmem:[%s280_s0] sm:$0xff] }
   0x8   :  { %176 = vmatpush3.msra.mxu0 %v29_v4 }
   0x9   :  { %177 = vmatprep.subr.mxu0 %v208_v0 }
   0xa   :  { %178 = vmatpush3.msra.mxu0 %v28_v5 }
   0xb   :  { %179 = vmatprep.subr.mxu0 %v208_v0 }
   0xc   :  { %180 = vmatpush3.msra.mxu0 %v27_v6 }
   0xd   :  { %181 = vmatprep.subr.mxu0 %v208_v0 }
   0xe   :  { %182 = vmatpush3.msra.mxu0 %v26_v7 }
   0xf   :  { %183 = vmatprep.subr.mxu0 %v208_v0 }
  0x10   :  { %184 = vmatpush3.msra.mxu0 %v25_v8 }
  0x11   :  { %185 = vmatprep.subr.mxu0 %v208_v0 }
  0x12   :  { %186 = vmatpush3.msra.mxu0 %v24_v9 }
  0x13   :  { %187 = vmatprep.subr.mxu0 %v208_v0 }
  0x14   :  { %188 = vmatpush3.msra.mxu0 %v23_v10 }
  0x15   :  { %189 = vmatprep.subr.mxu0 %v208_v0 }
  0x16   :  { %190 = vmatpush3.msra.mxu0 %v22_v11 }
  0x17   :  { %191 = vmatprep.subr.mxu0 %v208_v0 }
  0x18   :  { %192 = vmatpush3.msra.mxu0 %v21_v12 }
  0x19   :  { %193 = vmatprep.subr.mxu0 %v208_v0 }
  0x1a   :  { %194 = vmatpush3.msra.mxu0 %v20_v13 }
  0x1b   :  { %195 = vmatprep.subr.mxu0 %v208_v0 }
  0x1c   :  { %196 = vmatpush3.msra.mxu0 %v19_v14 }
  0x1d   :  { %197 = vmatprep.subr.mxu0 %v208_v0 }
  0x1e   :  { %198 = vmatpush3.msra.mxu0 %v18_v15 }
  0x1f   :  { %199 = vmatprep.subr.mxu0 %v208_v0 }
  0x20   :  { %200 = vmatpush3.msra.mxu0 %v17_v16 }
  0x21   :  { %202 = vmatmul.mubr.f32.vlgmr.msra.gmra.mxu0 %v16_v17 }
  0xe1   :  { %v99_v20 = vpop.f32.mrf.mxu0 }
  0xe2   :  { %v151_v21 = vadd.f32 -1.0, %v99_v20 }
  0xe3   :  { %v203_v22 = vpop.f32.mrf.mxu0 }
  0xe4   :  { %v130_v23 = vsel %vm129_vm1, %v151_v21, 0.0 }
  0xe5   :  { %v132_v24 = vmul.f32 %v130_v23, %v130_v23 }
  0xe7   :  { %v134_v25 = vsel %vm133_vm2, %v132_v24, 0.0 }
  0xe8   :  { %135 = vadd.xlane.f32.xlu0 %v134_v25 }
 0x171   :  { %v136_v26 = vpop.xlane.xlu0 %135 }
 0x172   :  { %v137_v27 = vrot.slane %v136_v26, 4 }
 0x174   :  { %v138_v28 = vadd.f32 %v137_v27, %v136_v26 }
 0x176   :  { %v139_v29 = vrot.slane %v138_v28, 2 }
 0x178   :  { %v140_v30 = vadd.f32 %v139_v29, %v138_v28 }
 0x17a   :  { %v141_v31 = vrot.slane %v140_v30, 1 }
 0x17c   :  { %v142_v32 = vadd.f32 %v141_v31, %v140_v30 }
 0x17e   :  { %204 = vpush %v142_v32 }
 0x1af   :  { %s205_s0 = spop %204 }
 0x1b0   :  { %v144_v33 = vstv %s205_s0 }
 0x1b1   :  { %146 = vst [vmem:[%s281_s2] sm:$0xff] %v144_v33 }

</bundles_post_ra>
